<compile_context>
chip_gen: v7x
topology: tpu7x:2x2x1
jax: 0.10.0
libtpu: 0.0.40
codegen_flags: <defaults>
</compile_context>

<pallas_src>
import functools
import math

import jax
import jax.numpy as jnp
from jax.experimental import pallas as pl
from jax.experimental.pallas import tpu as pltpu

_LANE = 128       # vreg lane width
_SUBLANE = 8      # vreg sublane count (f32)
_MXU_ROWS = 256   # MXU row dimension on v6e/v7x (v5e is 128; 256 is a multiple)

# Resident-weight budget per TensorCore. v7x has only 64 MiB VMEM/TC; leave
# headroom for double-buffered x/out tiles and f32 intermediates.
_WEIGHT_VMEM_BUDGET = 40 << 20


def _round_up(x, m):
    return ((x + m - 1) // m) * m


def _apply_activation(y, name):
    if name == "relu":
        return jnp.maximum(y, 0.0)
    if name == "selu":
        return jax.nn.selu(y)
    if name == "sigmoid":
        return jax.nn.sigmoid(y)
    if name == "linear":
        return y
    raise ValueError(f"unknown activation {name!r}")


def _fused_mlp_kernel(x_ref, *rest, activations):
    """Run a chunk of consecutive MLP layers on one batch tile.

    rest = (w0, b0, w1, b1, ..., w_{L-1}, b_{L-1}, out_ref).
    Weights arrive already in the MXU compute dtype (e.g. bf16); matmuls
    accumulate in f32 (preferred_element_type) and bias-add / activations stay
    f32 elementwise (v5e has no bf16 VPU/EUP). Intermediates never leave
    vregs/VMEM between layers.
    """
    out_ref = rest[-1]
    wb_refs = rest[:-1]
    n_layers = len(wb_refs) // 2

    h = x_ref[...].astype(jnp.float32)
    for i in range(n_layers):
        w = wb_refs[2 * i][...]          # pre-cast to compute dtype at init
        b = wb_refs[2 * i + 1][...]      # f32, [1, out_pad] broadcasts over batch
        y = jnp.dot(h.astype(w.dtype), w, preferred_element_type=jnp.float32)
        y = y + b
        h = _apply_activation(y, activations[i])
    out_ref[...] = h.astype(out_ref.dtype)


def init_mlp_params(key, input_dim, layer_sizes, output_dim,
                    compute_dtype=jnp.bfloat16):
    """Mirror MLP.initialize_weights(): weight ~ N(0, sqrt(1/in_features)), bias = 0.

    Weights are stored [in, out] (transpose of nn.Linear's [out, in]),
    zero-padded to multiples of 128 so every matmul is lane-dense, and
    pre-cast to `compute_dtype` (bf16 by default) so the kernel does no
    per-step weight casts and weight DMA/VMEM is halved. Biases stay f32.
    Returns (layer_params, logical_sizes).
    """
    sizes = [input_dim] + [int(s) for s in layer_sizes.split(",")] + [output_dim]
    pads = [_round_up(s, _LANE) for s in sizes]
    layer_params = []
    for i in range(len(sizes) - 1):
        key, wk = jax.random.split(key)
        fan_in, fan_out = sizes[i], sizes[i + 1]
        w = (jax.random.normal(wk, (fan_in, fan_out), dtype=jnp.float32)
             * math.sqrt(1.0 / fan_in))
        w_pad = (jnp.zeros((pads[i], pads[i + 1]), jnp.float32)
                 .at[:fan_in, :fan_out].set(w)).astype(compute_dtype)
        b_pad = jnp.zeros((1, pads[i + 1]), jnp.float32)
        layer_params.append((w_pad, b_pad))
    return layer_params, sizes


def _pick_bm(batch, batch_block):
    """Batch tile size.

    Small batches (<=256 rows): one sublane-aligned block.
    Larger batches: MXU-row (256) aligned, capped at batch_block, and chosen so
    the 'parallel' grid axis has >= 2 blocks (v7x megacore).
    """
    b_ceil = _round_up(batch, _SUBLANE)
    if b_ceil <= 256:
        return b_ceil
    half = _round_up((b_ceil + 1) // 2, _MXU_ROWS)
    return max(_MXU_ROWS, min(_round_up(batch_block, _MXU_ROWS), half))


def _chunk_layers(params_and_acts, budget_bytes):
    """Greedily group consecutive layers whose resident weights fit the budget."""
    chunks, cur, cur_bytes = [], [], 0
    for (w, b), act in params_and_acts:
        nb = w.size * w.dtype.itemsize + b.size * b.dtype.itemsize
        if cur and cur_bytes + nb > budget_bytes:
            chunks.append(cur)
            cur, cur_bytes = [], 0
        cur.append(((w, b), act))
        cur_bytes += nb
    if cur:
        chunks.append(cur)
    return chunks


def _fused_chunk_call(x_p, chunk_params, chunk_acts, bm, out_dtype):
    """One pallas_call running a consecutive chunk of layers on padded input x_p."""
    b_pad, in_pad = x_p.shape
    out_pad = chunk_params[-1][0].shape[1]
    n_blocks = b_pad // bm

    # x/out are tiled over the batch grid; weights/biases are whole-array and
    # grid-invariant -> single-buffered (double-buffering them hides nothing).
    in_specs = [pl.BlockSpec((bm, in_pad), lambda i: (i, 0))]
    flat_wb = []
    for (w, b) in chunk_params:
        in_specs.append(pl.BlockSpec(w.shape, lambda i: (0, 0),
                                     pipeline_mode=pl.Buffered(1)))
        in_specs.append(pl.BlockSpec(b.shape, lambda i: (0, 0),
                                     pipeline_mode=pl.Buffered(1)))
        flat_wb.extend([w, b])
    out_specs = pl.BlockSpec((bm, out_pad), lambda i: (i, 0))

    # Advisory cost estimate for XLA's scheduler.
    flops = sum(2 * b_pad * w.shape[0] * w.shape[1] for (w, _) in chunk_params)
    transcendentals = sum(b_pad * w.shape[1]
                          for (w, _), a in zip(chunk_params, chunk_acts)
                          if a in ("selu", "sigmoid"))
    out_itemsize = jnp.dtype(out_dtype).itemsize
    bytes_accessed = (x_p.size * x_p.dtype.itemsize
                      + sum(a.size * a.dtype.itemsize for a in flat_wb)
                      + b_pad * out_pad * out_itemsize)

    # Explicit scoped-VMEM limit with headroom (defaults are only 16/32 MiB):
    # weights (single-buffered) + 2x in/out batch tiles + a few live f32
    # intermediates of the widest layer.
    weight_bytes = sum(a.size * a.dtype.itemsize for a in flat_wb)
    widest = max(max(w.shape) for (w, _) in chunk_params)
    need = (weight_bytes
            + 2 * bm * in_pad * x_p.dtype.itemsize
            + 2 * bm * out_pad * out_itemsize
            + 4 * bm * widest * 4)
    vmem_limit = int(min(max(2 * need, 32 << 20), 64 << 20))

    kernel = functools.partial(_fused_mlp_kernel, activations=tuple(chunk_acts))
    return pl.pallas_call(
        kernel,
        out_shape=jax.ShapeDtypeStruct((b_pad, out_pad), out_dtype),
        grid=(n_blocks,),
        in_specs=in_specs,
        out_specs=out_specs,
        compiler_params=pltpu.CompilerParams(
            dimension_semantics=("parallel",),
            vmem_limit_bytes=vmem_limit),
        cost_estimate=pl.CostEstimate(flops=flops,
                                      transcendentals=transcendentals,
                                      bytes_accessed=bytes_accessed),
    )(x_p, *flat_wb)


def mlp_forward(x, mlp_params, activation="relu", last_layer_activation="relu",
                batch_block=512, weight_vmem_budget=_WEIGHT_VMEM_BUDGET):
    """Forward pass matching MLP.forward (batch_norm=False, dp_prob=0.0)."""
    layer_params, sizes = mlp_params
    batch, in_dim = x.shape
    assert in_dim == sizes[0], "input feature dim mismatch"
    n_layers = len(layer_params)
    activations = [activation] * (n_layers - 1) + [last_layer_activation]

    # ---- batch tiling (sublane/MXU-row aligned, "parallel" grid axis) ----
    bm = _pick_bm(batch, batch_block)
    b_pad = _round_up(batch, bm)

    in_pad = layer_params[0][0].shape[0]
    x_p = jnp.zeros((b_pad, in_pad), x.dtype).at[:batch, :in_dim].set(x)

    # ---- VMEM budget check: fuse as many consecutive layers as fit ----
    chunks = _chunk_layers(list(zip(layer_params, activations)), weight_vmem_budget)

    h = x_p
    for chunk in chunks:
        chunk_params = [lp for lp, _ in chunk]
        chunk_acts = [a for _, a in chunk]
        h = _fused_chunk_call(h, chunk_params, chunk_acts, bm, x.dtype)

    return h[:batch, :sizes[-1]]


if __name__ == "__main__":
    # Small shapes consistent with the module's constructor:
    # MLP(input_dim=16, output_dim=8, layer_sizes='32,32'), batch=8.
    batch, input_dim, output_dim = 8, 16, 8
    layer_sizes = "32,32"

    key = jax.random.PRNGKey(0)
    key, xk = jax.random.split(key)
    x = jax.random.normal(xk, (batch, input_dim), dtype=jnp.float32)

    # bf16 weights for the MXU (default); f32 accumulation + f32 elementwise.
    mlp_params = init_mlp_params(key, input_dim, layer_sizes, output_dim,
                                 compute_dtype=jnp.bfloat16)

    out = mlp_forward(x, mlp_params,
                      activation="relu", last_layer_activation="relu")
    out = jax.block_until_ready(out)

    # Sanity check against a plain-JAX reference that mirrors the kernel's
    # numerics (bf16 matmul inputs, f32 accumulation) on the LOGICAL shapes.
    layer_params, sizes = mlp_params
    ref = x
    for i, (w_pad, b_pad_arr) in enumerate(layer_params):
        w = w_pad[:sizes[i], :sizes[i + 1]].astype(jnp.float32)
        b = b_pad_arr[:, :sizes[i + 1]]
        ref = jnp.dot(ref.astype(w_pad.dtype).astype(jnp.float32), w,
                      precision=jax.lax.Precision.HIGHEST) + b
        ref = jnp.maximum(ref, 0.0)  # ReLU on hidden layers and on the last layer

    assert out.shape == (batch, output_dim)
    assert jnp.allclose(out, ref, atol=1e-2, rtol=1e-2), "mismatch vs reference"

    print("KERNEL_OK")
</pallas_src>

<mosaic_0001>
module attributes {stable_mosaic.version = 11 : i64} {
  func.func @_fused_mlp_kernel(%arg0: i32, %arg1: memref<8x128xf32, #tpu.memory_space<vmem>>, %arg2: memref<128x128xbf16, #tpu.memory_space<vmem>>, %arg3: memref<1x128xf32, #tpu.memory_space<vmem>>, %arg4: memref<128x128xbf16, #tpu.memory_space<vmem>>, %arg5: memref<1x128xf32, #tpu.memory_space<vmem>>, %arg6: memref<128x128xbf16, #tpu.memory_space<vmem>>, %arg7: memref<1x128xf32, #tpu.memory_space<vmem>>, %arg8: memref<8x128xf32, #tpu.memory_space<vmem>>) attributes {dimension_semantics = [#tpu.dimension_semantics<parallel>], iteration_bounds = array<i64: 1>, scalar_prefetch = 0 : i64, scratch_operands = 0 : i64, tpu.core_type = #tpu.core_type<tc>, window_params = [{transform_indices = @transform_0, window_bounds = array<i64: 8, 128>}, {pipeline_mode = #tpu.pipeline_mode<synchronous>, transform_indices = @transform_1, window_bounds = array<i64: 128, 128>}, {pipeline_mode = #tpu.pipeline_mode<synchronous>, transform_indices = @transform_2, window_bounds = array<i64: 1, 128>}, {pipeline_mode = #tpu.pipeline_mode<synchronous>, transform_indices = @transform_3, window_bounds = array<i64: 128, 128>}, {pipeline_mode = #tpu.pipeline_mode<synchronous>, transform_indices = @transform_4, window_bounds = array<i64: 1, 128>}, {pipeline_mode = #tpu.pipeline_mode<synchronous>, transform_indices = @transform_5, window_bounds = array<i64: 128, 128>}, {pipeline_mode = #tpu.pipeline_mode<synchronous>, transform_indices = @transform_6, window_bounds = array<i64: 1, 128>}, {transform_indices = @transform_7, window_bounds = array<i64: 8, 128>}]} {
    %c0 = arith.constant 0 : index
    %c0_0 = arith.constant 0 : index
    %0 = vector.load %arg1[%c0, %c0_0] : memref<8x128xf32, #tpu.memory_space<vmem>>, vector<8x128xf32>
    %c0_1 = arith.constant 0 : index
    %c0_2 = arith.constant 0 : index
    %1 = vector.load %arg2[%c0_1, %c0_2] : memref<128x128xbf16, #tpu.memory_space<vmem>>, vector<128x128xbf16>
    %c0_3 = arith.constant 0 : index
    %c0_4 = arith.constant 0 : index
    %2 = vector.load %arg3[%c0_3, %c0_4] : memref<1x128xf32, #tpu.memory_space<vmem>>, vector<1x128xf32>
    %3 = arith.truncf %0 : vector<8x128xf32> to vector<8x128xbf16>
    %cst = arith.constant dense<0.000000e+00> : vector<8x128xf32>
    %4 = tpu.matmul %3, %1, %cst {dimension_numbers = #tpu.dot_dimension_numbers<[1], [0], [0], [1], [0, 0, 1, 1], [], []>} : vector<8x128xbf16>, vector<128x128xbf16>, vector<8x128xf32> -> vector<8x128xf32>
    %5 = vector.broadcast %2 : vector<1x128xf32> to vector<8x128xf32>
    %6 = arith.addf %4, %5 : vector<8x128xf32>
    %cst_5 = arith.constant 0.000000e+00 : f32
    %7 = vector.broadcast %cst_5 : f32 to vector<8x128xf32>
    %8 = arith.maximumf %6, %7 : vector<8x128xf32>
    %c0_6 = arith.constant 0 : index
    %c0_7 = arith.constant 0 : index
    %9 = vector.load %arg4[%c0_6, %c0_7] : memref<128x128xbf16, #tpu.memory_space<vmem>>, vector<128x128xbf16>
    %c0_8 = arith.constant 0 : index
    %c0_9 = arith.constant 0 : index
    %10 = vector.load %arg5[%c0_8, %c0_9] : memref<1x128xf32, #tpu.memory_space<vmem>>, vector<1x128xf32>
    %11 = arith.truncf %8 : vector<8x128xf32> to vector<8x128xbf16>
    %cst_10 = arith.constant dense<0.000000e+00> : vector<8x128xf32>
    %12 = tpu.matmul %11, %9, %cst_10 {dimension_numbers = #tpu.dot_dimension_numbers<[1], [0], [0], [1], [0, 0, 1, 1], [], []>} : vector<8x128xbf16>, vector<128x128xbf16>, vector<8x128xf32> -> vector<8x128xf32>
    %13 = vector.broadcast %10 : vector<1x128xf32> to vector<8x128xf32>
    %14 = arith.addf %12, %13 : vector<8x128xf32>
    %cst_11 = arith.constant 0.000000e+00 : f32
    %15 = vector.broadcast %cst_11 : f32 to vector<8x128xf32>
    %16 = arith.maximumf %14, %15 : vector<8x128xf32>
    %c0_12 = arith.constant 0 : index
    %c0_13 = arith.constant 0 : index
    %17 = vector.load %arg6[%c0_12, %c0_13] : memref<128x128xbf16, #tpu.memory_space<vmem>>, vector<128x128xbf16>
    %c0_14 = arith.constant 0 : index
    %c0_15 = arith.constant 0 : index
    %18 = vector.load %arg7[%c0_14, %c0_15] : memref<1x128xf32, #tpu.memory_space<vmem>>, vector<1x128xf32>
    %19 = arith.truncf %16 : vector<8x128xf32> to vector<8x128xbf16>
    %cst_16 = arith.constant dense<0.000000e+00> : vector<8x128xf32>
    %20 = tpu.matmul %19, %17, %cst_16 {dimension_numbers = #tpu.dot_dimension_numbers<[1], [0], [0], [1], [0, 0, 1, 1], [], []>} : vector<8x128xbf16>, vector<128x128xbf16>, vector<8x128xf32> -> vector<8x128xf32>
    %21 = vector.broadcast %18 : vector<1x128xf32> to vector<8x128xf32>
    %22 = arith.addf %20, %21 : vector<8x128xf32>
    %cst_17 = arith.constant 0.000000e+00 : f32
    %23 = vector.broadcast %cst_17 : f32 to vector<8x128xf32>
    %24 = arith.maximumf %22, %23 : vector<8x128xf32>
    %c0_18 = arith.constant 0 : index
    %c0_19 = arith.constant 0 : index
    %25 = vector.load %arg8[%c0_18, %c0_19] : memref<8x128xf32, #tpu.memory_space<vmem>>, vector<8x128xf32>
    tpu.vector_store %arg8[%c0_18, %c0_19], %24 {strides = array<i32>} : memref<8x128xf32, #tpu.memory_space<vmem>>, vector<8x128xf32>,
    return
  }
  func.func @transform_0(%arg0: i32) -> (i32, i32) {
    %c0_i32 = arith.constant 0 : i32
    %c0_i32_0 = arith.constant 0 : i32
    return %arg0, %c0_i32 : i32, i32
  }
  func.func @transform_1(%arg0: i32) -> (i32, i32) {
    %c0_i32 = arith.constant 0 : i32
    %c0_i32_0 = arith.constant 0 : i32
    %c0_i32_1 = arith.constant 0 : i32
    return %c0_i32, %c0_i32_0 : i32, i32
  }
  func.func @transform_2(%arg0: i32) -> (i32, i32) {
    %c0_i32 = arith.constant 0 : i32
    %c0_i32_0 = arith.constant 0 : i32
    %c0_i32_1 = arith.constant 0 : i32
    return %c0_i32, %c0_i32_0 : i32, i32
  }
  func.func @transform_3(%arg0: i32) -> (i32, i32) {
    %c0_i32 = arith.constant 0 : i32
    %c0_i32_0 = arith.constant 0 : i32
    %c0_i32_1 = arith.constant 0 : i32
    return %c0_i32, %c0_i32_0 : i32, i32
  }
  func.func @transform_4(%arg0: i32) -> (i32, i32) {
    %c0_i32 = arith.constant 0 : i32
    %c0_i32_0 = arith.constant 0 : i32
    %c0_i32_1 = arith.constant 0 : i32
    return %c0_i32, %c0_i32_0 : i32, i32
  }
  func.func @transform_5(%arg0: i32) -> (i32, i32) {
    %c0_i32 = arith.constant 0 : i32
    %c0_i32_0 = arith.constant 0 : i32
    %c0_i32_1 = arith.constant 0 : i32
    return %c0_i32, %c0_i32_0 : i32, i32
  }
  func.func @transform_6(%arg0: i32) -> (i32, i32) {
    %c0_i32 = arith.constant 0 : i32
    %c0_i32_0 = arith.constant 0 : i32
    %c0_i32_1 = arith.constant 0 : i32
    return %c0_i32, %c0_i32_0 : i32, i32
  }
  func.func @transform_7(%arg0: i32) -> (i32, i32) {
    %c0_i32 = arith.constant 0 : i32
    %c0_i32_0 = arith.constant 0 : i32
    return %arg0, %c0_i32 : i32, i32
  }
}

</mosaic_0001>

<bundles_post_ra>
// kernel: tpu_custom_call.1
= control target key start
LH: loop header
LB: loop body
LE: loop exit
PB: predicated region body
PF: predicated region fallthrough
CT: control target
= control target key end

     0   :  { %12 = vsyncpa [#allocation3], 0  ;;  %s861_s0 = inlined_call_operand.hbm [shape: f32[8,128], index: 0, kind: input, shape index: {}]   ;;  %s862_s1 = inlined_call_operand.hbm [shape: bf16[128,128], index: 1, kind: input, shape index: {}]   ;;  %s863_s2 = inlined_call_operand.vmem [shape: f32[1,128], index: 2, kind: input, shape index: {}]   ;;  %s864_s3 = inlined_call_operand.hbm [shape: bf16[128,128], index: 3, kind: input, shape index: {}]   ;;  %s865_s4 = inlined_call_operand.vmem [shape: f32[1,128], index: 4, kind: input, shape index: {}]   ;;  %s866_s5 = inlined_call_operand.hbm [shape: bf16[128,128], index: 5, kind: input, shape index: {}]   ;;  %s867_s6 = inlined_call_operand.vmem [shape: f32[1,128], index: 6, kind: input, shape index: {}]   ;;  %s868_s7 = inlined_call_operand.hbm [shape: f32[8,128], index: 7, kind: output, shape index: {}]  }
   0x1   :  { %13 = vsyncpa [#allocation6], 0 }
   0x2   :  { %14 = vsyncpa [#allocation9], 0 }
   0x3   :  { %15 = vsyncpa [#allocation4], 0  ;;  %s704_s24 = smov [#allocation5]   ;;  %s586_s28 = scalar_lea.hbm %s862_s1, 1024 }
   0x4   :  { %s31_s25 = sshll.u32 %s704_s24, 4  ;;  %p587_p0 = scmp.ne.s32.totalorder %s862_s1, %s586_s28  ;;  %s32_s25 = int_to_ptr.vmem [resolvable:$true] %s31_s25 }
   0x5   :  { %p590_p1 = scmp.lt.u32.totalorder %s586_s28, %s862_s1 }
   0x7   :  { %p592_p2 = pnand %p590_p1, %p587_p0 }
   0x9   :  { %595 = shalt.err (!%p592_p2)
}
   0xa   :  { %s596_s10 = scalar_lea.vmem %s32_s25, 1024  ;;  %p601_p4 = scmp.lt.s32.totalorder %s32_s25, %s32_s25 }
   0xb   :  { %p597_p3 = scmp.ne.s32.totalorder %s32_s25, %s596_s10  ;;  %p602_p5 = scmp.lt.s32.totalorder %s596_s10, %s596_s10 }
   0xd   :  { %p603_p6 = por %p602_p5, %p601_p4 }
   0xf   :  { %p604_p7 = pnand %p603_p6, %p597_p3 }
  0x11   :  { %607 = shalt.err (!%p604_p7)
}
  0x12   :  { %s705_s11 = smov 64   ;;  %s706_s12 = smov 4  }
  0x13   :  { %37 = dma.hbm_to_vmem [thread:$0]  %s862_s1, 1024, %s32_s25, [#allocation6], %s705_s11, %s705_s11, %s706_s12  }
  0x14   :  { %s707_s15 = smov [#allocation2]   ;;  %s708_s17 = smov [#allocation7]  }
  0x15   :  { %s22_s16 = sshll.u32 %s707_s15, 4  ;;  %s45_s18 = sshll.u32 %s708_s17, 4  ;;  %s23_s16 = int_to_ptr.vmem [resolvable:$true] %s22_s16  ;;  %s46_s18 = int_to_ptr.vmem [resolvable:$true] %s45_s18 }
  0x16   :  { %s608_s21 = scalar_lea.hbm %s861_s0, 128 }
  0x17   :  { %p609_p8 = scmp.ne.s32.totalorder %s861_s0, %s608_s21  ;;  %p612_p9 = scmp.lt.u32.totalorder %s608_s21, %s861_s0 }
  0x19   :  { %p614_p10 = pnand %p612_p9, %p609_p8 }
  0x1b   :  { %617 = shalt.err (!%p614_p10)
}
  0x1c   :  { %s618_s1 = scalar_lea.vmem %s23_s16, 128  ;;  %p623_p12 = scmp.lt.s32.totalorder %s23_s16, %s23_s16 }
  0x1d   :  { %p619_p11 = scmp.ne.s32.totalorder %s23_s16, %s618_s1  ;;  %p624_p13 = scmp.lt.s32.totalorder %s618_s1, %s618_s1 }
  0x1f   :  { %p625_p0 = por %p624_p13, %p623_p12 }
  0x21   :  { %p626_p1 = pnand %p625_p0, %p619_p11 }
  0x23   :  { %629 = shalt.err (!%p626_p1)
}
  0x24   :  { %25 = dma.hbm_to_vmem [thread:$0]  %s861_s0, 128, %s23_s16, [#allocation3]  }
  0x25   :  { %s630_s30 = scalar_lea.hbm %s864_s3, 1024 }
  0x26   :  { %p631_p2 = scmp.ne.s32.totalorder %s864_s3, %s630_s30  ;;  %p634_p3 = scmp.lt.u32.totalorder %s630_s30, %s864_s3 }
  0x28   :  { %p636_p4 = pnand %p634_p3, %p631_p2 }
  0x2a   :  { %639 = shalt.err (!%p636_p4)
}
  0x2b   :  { %s640_s14 = scalar_lea.vmem %s46_s18, 1024  ;;  %p645_p6 = scmp.lt.s32.totalorder %s46_s18, %s46_s18 }
  0x2c   :  { %p641_p5 = scmp.ne.s32.totalorder %s46_s18, %s640_s14  ;;  %p646_p7 = scmp.lt.s32.totalorder %s640_s14, %s640_s14 }
  0x2e   :  { %p647_p8 = por %p646_p7, %p645_p6 }
  0x30   :  { %p648_p9 = pnand %p647_p8, %p641_p5 }
  0x32   :  { %651 = shalt.err (!%p648_p9)
}
  0x33   :  { %51 = dma.hbm_to_vmem [thread:$0]  %s864_s3, 1024, %s46_s18, [#allocation6], %s705_s11, %s705_s11, %s706_s12  }
  0x34   :  { %s709_s16 = smov [#allocation8]   ;;  %s652_s21 = scalar_lea.hbm %s866_s5, 1024 }
  0x35   :  { %s59_s17 = sshll.u32 %s709_s16, 4  ;;  %p653_p10 = scmp.ne.s32.totalorder %s866_s5, %s652_s21  ;;  %s60_s17 = int_to_ptr.vmem [resolvable:$true] %s59_s17 }
  0x36   :  { %p656_p11 = scmp.lt.u32.totalorder %s652_s21, %s866_s5 }
  0x38   :  { %p658_p12 = pnand %p656_p11, %p653_p10 }
  0x3a   :  { %661 = shalt.err (!%p658_p12)
}
  0x3b   :  { %s662_s1 = scalar_lea.vmem %s60_s17, 1024  ;;  %p667_p0 = scmp.lt.s32.totalorder %s60_s17, %s60_s17 }
  0x3c   :  { %p663_p13 = scmp.ne.s32.totalorder %s60_s17, %s662_s1  ;;  %p668_p1 = scmp.lt.s32.totalorder %s662_s1, %s662_s1 }
  0x3e   :  { %p669_p2 = por %p668_p1, %p667_p0 }
  0x40   :  { %p670_p3 = pnand %p669_p2, %p663_p13 }
  0x42   :  { %673 = shalt.err (!%p670_p3)
}
  0x43   :  { %65 = dma.hbm_to_vmem [thread:$0]  %s866_s5, 1024, %s60_s17, [#allocation9], %s705_s11, %s705_s11, %s706_s12  }
  0x44   :  { %696 = dma.done.wait [#allocation3], 128  }
  0x45   :  { %697 = vsyncadd [#allocation3], 4294967168 }
  0x46   :  { %698 = dma.done.wait [#allocation6], 2048  }
  0x47   :  { %699 = vsyncadd [#allocation6], 4294965248 }
  0x48   :  { %700 = dma.done.wait [#allocation9], 1024  }
  0x49   :  { %701 = vsyncadd [#allocation9], 4294966272  ;;  %v710_v0 = vmov 0.0   ;;  %vm711_vm0 = vmmov 0   ;;  %v562_v1 = vld [vmem:[#allocation5] sm:$0xff]   ;;  %v563_v2 = vld [vmem:[#allocation5 + $0x8] sm:$0xff]  }
  0x4a   :  { %493 = vmatprep.subr.bf16.mxu0 %v710_v0  ;;  %509 = vmatprep.mubr.msk.bf16.mxu0 %vm711_vm0, %v710_v0  ;;  %v564_v3 = vld [vmem:[#allocation5 + $0x10] sm:$0xff]   ;;  %v570_v4 = vld [vmem:[#allocation7] sm:$0xff]   ;;  %v565_v5 = vld [vmem:[#allocation5 + $0x18] sm:$0xff]   ;;  %s712_s28 = smov [#allocation10]  }
  0x4b   :  { %513 = vmatprep.subr.bf16.mxu1 %v710_v0  ;;  %529 = vmatprep.mubr.msk.bf16.mxu1 %vm711_vm0, %v710_v0  ;;  %v571_v6 = vld [vmem:[#allocation7 + $0x8] sm:$0xff]   ;;  %v566_v7 = vld [vmem:[#allocation5 + $0x20] sm:$0xff]   ;;  %v572_v8 = vld [vmem:[#allocation7 + $0x10] sm:$0xff]   ;;  %s428_s29 = sshll.u32 %s712_s28, 4  ;;  %s429_s29 = int_to_ptr.vmem [resolvable:$true] %s428_s29 }
  0x4c   :  { %494 = vmatpush3.bf16.msra.mxu0 %v562_v1  ;;  %514 = vmatpush3.bf16.msra.mxu1 %v570_v4  ;;  %v567_v9 = vld [vmem:[#allocation5 + $0x28] sm:$0xff]   ;;  %v573_v10 = vld [vmem:[#allocation7 + $0x18] sm:$0xff]   ;;  %v568_v11 = vld [vmem:[#allocation5 + $0x30] sm:$0xff]   ;;  %p679_p5 = scmp.lt.s32.totalorder %s429_s29, %s429_s29 }
  0x4d   :  { %495 = vmatprep.subr.bf16.mxu0 %v710_v0  ;;  %515 = vmatprep.subr.bf16.mxu1 %v710_v0  ;;  %v574_v12 = vld [vmem:[#allocation7 + $0x20] sm:$0xff]   ;;  %v569_v13 = vld [vmem:[#allocation5 + $0x38] sm:$0xff]   ;;  %v575_v15 = vld [vmem:[#allocation7 + $0x28] sm:$0xff]  }
  0x4e   :  { %v81_v14 = vld [vmem:[#allocation2] sm:$0xff]  ;;  %v576_v17 = vld [vmem:[#allocation7 + $0x30] sm:$0xff]   ;;  %v578_v19 = vld [vmem:[#allocation8] sm:$0xff]  }
  0x4f   :  { %v99_v16 = vpack.c.bf16 %v81_v14, %v81_v14  ;;  %v577_v18 = vld [vmem:[#allocation7 + $0x38] sm:$0xff]   ;;  %v579_v20 = vld [vmem:[#allocation8 + $0x8] sm:$0xff]   ;;  %v580_v21 = vld [vmem:[#allocation8 + $0x10] sm:$0xff]  }
  0x50   :  { %496 = vmatpush3.bf16.msra.mxu0 %v563_v2  ;;  %516 = vmatpush3.bf16.msra.mxu1 %v571_v6  ;;  %v581_v22 = vld [vmem:[#allocation8 + $0x18] sm:$0xff]   ;;  %v582_v23 = vld [vmem:[#allocation8 + $0x20] sm:$0xff]   ;;  %v583_v24 = vld [vmem:[#allocation8 + $0x28] sm:$0xff]  }
  0x51   :  { %497 = vmatprep.subr.bf16.mxu0 %v710_v0  ;;  %517 = vmatprep.subr.bf16.mxu1 %v710_v0  ;;  %v439_v25 = vld [vmem:[%s863_s2] ss:$0 sm:$0xff]  ;;  %v584_v33 = vld [vmem:[#allocation8 + $0x30] sm:$0xff]  }
  0x52   :  { %v585_v34 = vld [vmem:[#allocation8 + $0x38] sm:$0xff]  }
  0x53   :  { %v448_v35 = vld [vmem:[%s865_s4] ss:$0 sm:$0xff]  ;;  %s674_s4 = scalar_lea.vmem %s429_s29, 128 }
  0x54   :  { %498 = vmatpush3.bf16.msra.mxu0 %v564_v3  ;;  %518 = vmatpush3.bf16.msra.mxu1 %v572_v8  ;;  %v457_v43 = vld [vmem:[%s867_s6] ss:$0 sm:$0xff]  ;;  %p675_p4 = scmp.ne.s32.totalorder %s429_s29, %s674_s4  ;;  %p680_p6 = scmp.lt.s32.totalorder %s674_s4, %s674_s4 }
  0x55   :  { %499 = vmatprep.subr.bf16.mxu0 %v710_v0  ;;  %519 = vmatprep.subr.bf16.mxu1 %v710_v0 }
  0x56   :  { %p681_p7 = por %p680_p6, %p679_p5 }
  0x58   :  { %500 = vmatpush3.bf16.msra.mxu0 %v565_v5  ;;  %520 = vmatpush3.bf16.msra.mxu1 %v573_v10  ;;  %p682_p8 = pnand %p681_p7, %p675_p4 }
  0x59   :  { %501 = vmatprep.subr.bf16.mxu0 %v710_v0  ;;  %521 = vmatprep.subr.bf16.mxu1 %v710_v0 }
  0x5c   :  { %502 = vmatpush3.bf16.msra.mxu0 %v566_v7  ;;  %522 = vmatpush3.bf16.msra.mxu1 %v574_v12 }
  0x5d   :  { %503 = vmatprep.subr.bf16.mxu0 %v710_v0  ;;  %523 = vmatprep.subr.bf16.mxu1 %v710_v0 }
  0x60   :  { %504 = vmatpush3.bf16.msra.mxu0 %v567_v9  ;;  %524 = vmatpush3.bf16.msra.mxu1 %v575_v15 }
  0x61   :  { %505 = vmatprep.subr.bf16.mxu0 %v710_v0  ;;  %525 = vmatprep.subr.bf16.mxu1 %v710_v0 }
  0x64   :  { %506 = vmatpush3.bf16.msra.mxu0 %v568_v11  ;;  %526 = vmatpush3.bf16.msra.mxu1 %v576_v17 }
  0x65   :  { %507 = vmatprep.subr.bf16.mxu0 %v710_v0  ;;  %527 = vmatprep.subr.bf16.mxu1 %v710_v0 }
  0x68   :  { %508 = vmatpush3.bf16.msra.mxu0 %v569_v13  ;;  %528 = vmatpush3.bf16.msra.mxu1 %v577_v18 }
  0x69   :  { %533 = vmatprep.subr.bf16.mxu0 %v710_v0 }
  0x6b   :  { %510 = vmatmul.mubr.bf16.vlgmr.msra.gmra.mrb[0].mxu0 %v99_v16 }
  0x6c   :  { %549 = vmatprep.mubr.msk.bf16.mxu0 %vm711_vm0, %v710_v0  ;;  %534 = vmatpush3.bf16.msra.mxu0 %v578_v19 }
  0x6d   :  { %535 = vmatprep.subr.bf16.mxu0 %v710_v0 }
  0x70   :  { %536 = vmatpush3.bf16.msra.mxu0 %v579_v20 }
  0x71   :  { %537 = vmatprep.subr.bf16.mxu0 %v710_v0 }
  0x74   :  { %538 = vmatpush3.bf16.msra.mxu0 %v580_v21 }
  0x75   :  { %539 = vmatprep.subr.bf16.mxu0 %v710_v0 }
  0x78   :  { %540 = vmatpush3.bf16.msra.mxu0 %v581_v22 }
  0x79   :  { %541 = vmatprep.subr.bf16.mxu0 %v710_v0 }
  0x7c   :  { %542 = vmatpush3.bf16.msra.mxu0 %v582_v23 }
  0x7d   :  { %543 = vmatprep.subr.bf16.mxu0 %v710_v0 }
  0x80   :  { %544 = vmatpush3.bf16.msra.mxu0 %v583_v24 }
  0x81   :  { %545 = vmatprep.subr.bf16.mxu0 %v710_v0 }
  0x84   :  { %546 = vmatpush3.bf16.msra.mxu0 %v584_v33 }
  0x85   :  { %547 = vmatprep.subr.bf16.mxu0 %v710_v0 }
  0x88   :  { %548 = vmatpush3.bf16.msra.mxu0 %v585_v34 }
 0x13e   :  { %v188_v26 = vpop.f32.mrb[0].mxu0 }
 0x13f   :  { %v189_v27 = vadd.f32 %v439_v25, %v188_v26  ;;  %v511_v28 = vpop.f32.mrb[1].mxu0 }
 0x140   :  { %v191_v29 = vpop.f32.mrb[2].mxu0 }
 0x141   :  { %v194_v30 = vmax.f32 %v189_v27, 0.0  ;;  %v512_v31 = vpop.f32.mrb[3].mxu0 }
 0x143   :  { %v212_v32 = vpack.c.bf16 %v194_v30, %v194_v30 }
 0x145   :  { %530 = vmatmul.mubr.bf16.vlgmr.msra.gmra.mrb[0].mxu1 %v212_v32 }
 0x218   :  { %v301_v36 = vpop.f32.mrb[0].mxu1 }
 0x219   :  { %v302_v37 = vadd.f32 %v448_v35, %v301_v36  ;;  %v531_v38 = vpop.f32.mrb[1].mxu1 }
 0x21a   :  { %v304_v39 = vpop.f32.mrb[2].mxu1 }
 0x21b   :  { %v307_v40 = vmax.f32 %v302_v37, 0.0  ;;  %v532_v41 = vpop.f32.mrb[3].mxu1 }
 0x21d   :  { %v325_v42 = vpack.c.bf16 %v307_v40, %v307_v40 }
 0x21f   :  { %550 = vmatmul.mubr.bf16.vlgmr.msra.gmra.mrb[4].mxu0 %v325_v42 }
 0x2f2   :  { %v414_v44 = vpop.f32.mrb[4].mxu0 }
 0x2f3   :  { %v415_v45 = vadd.f32 %v457_v43, %v414_v44  ;;  %v551_v46 = vpop.f32.mrb[5].mxu0 }
 0x2f4   :  { %v417_v47 = vpop.f32.mrb[6].mxu0 }
 0x2f5   :  { %v420_v48 = vmax.f32 %v415_v45, 0.0  ;;  %v552_v49 = vpop.f32.mrb[7].mxu0 }
 0x2f7   :  { %421 = vst [vmem:[#allocation10] sm:$0xff] %v420_v48 }
 0x2f8   :  { %685 = shalt.err (!%p682_p8)
}
 0x2f9   :  { %s686_s6 = scalar_lea.hbm %s868_s7, 128 }
 0x2fa   :  { %p687_p9 = scmp.ne.s32.totalorder %s868_s7, %s686_s6  ;;  %p690_p10 = scmp.lt.u32.totalorder %s686_s6, %s868_s7 }
 0x2fc   :  { %p692_p11 = pnand %p690_p10, %p687_p9 }
 0x2fe   :  { %695 = shalt.err (!%p692_p11)
}
 0x2ff   :  { %431 = dma.vmem_to_hbm [thread:$0]  %s429_s29, 128, %s868_s7, [#allocation4]  }
 0x300   :  { %702 = dma.done.wait [#allocation4], 128  }
 0x301   :  { %703 = vsyncadd [#allocation4], 4294967168 }
 0x302   :  { %435 = vsyncpa [#allocation3], 1 }
 0x303   :  { %436 = vsyncpa [#allocation6], 1 }
 0x304   :  { %437 = vsyncpa [#allocation9], 1 }
 0x305   :  { %438 = vsyncpa [#allocation4], 1 }

</bundles_post_ra>
